<compile_context>
chip_gen: v5e
topology: v5e:2x2
jax: 0.10.0
libtpu: 0.0.40
codegen_flags: <defaults>
</compile_context>

<pallas_src>
import math
import functools

import jax
import jax.numpy as jnp
from jax.experimental import pallas as pl
from jax.experimental.pallas import tpu as pltpu


# ----------------------------------------------------------------------------------
# small helpers (f32 elementwise path)
# ----------------------------------------------------------------------------------
def _layernorm(h, gamma, beta, eps=1e-5):
    mu = jnp.mean(h, axis=-1, keepdims=True)
    var = jnp.mean((h - mu) ** 2, axis=-1, keepdims=True)
    return (h - mu) * jax.lax.rsqrt(var + eps) * gamma + beta


def _gelu_tanh(x):
    # GELU, tanh approximation (single EUP transcendental per element).
    # TODO(synk): PyTorch F.gelu defaults to the erf-exact form; difference is ~1e-3.
    c = math.sqrt(2.0 / math.pi)
    return 0.5 * x * (1.0 + jnp.tanh(c * (x + 0.044715 * x * x * x)))


# ----------------------------------------------------------------------------------
# Embedding kernel:  out = x @ W_wte + pos_emb        (embd dropout = identity)
# ----------------------------------------------------------------------------------
def embed_kernel(x_ref, wte_ref, pos_ref, o_ref):
    x16 = x_ref[0].astype(jnp.bfloat16)                                   # (T, F)
    tok = jnp.dot(x16, wte_ref[...], preferred_element_type=jnp.float32)  # (T, C)
    o_ref[0] = tok + pos_ref[...]


def embed(x, wte, pos_emb):
    B, T, F = x.shape
    C = wte.shape[1]
    return pl.pallas_call(
        embed_kernel,
        out_shape=jax.ShapeDtypeStruct((B, T, C), jnp.float32),
        grid=(B,),
        in_specs=[
            pl.BlockSpec((1, T, F), lambda b: (b, 0, 0)),
            pl.BlockSpec((F, C), lambda b: (0, 0)),
            pl.BlockSpec((T, C), lambda b: (0, 0)),
        ],
        out_specs=pl.BlockSpec((1, T, C), lambda b: (b, 0, 0)),
        compiler_params=pltpu.CompilerParams(dimension_semantics=("parallel",)),
    )(x, wte.astype(jnp.bfloat16), pos_emb)


# ----------------------------------------------------------------------------------
# Fused transformer Block kernel (LN -> MHSA -> +res -> LN -> MLP -> +res)
# grid = (B, num_q_tiles, num_kv_tiles); online softmax over the kv axis.
# ----------------------------------------------------------------------------------
def block_kernel(
    xq_ref, xkv_ref,
    ln1_g_ref, ln1_b_ref,
    wq_ref, wk_ref, wv_ref,
    bq_ref, bk_ref, bv_ref,
    wproj_ref, bproj_ref,
    ln2_g_ref, ln2_b_ref,
    wfc_ref, bfc_ref,
    wfp_ref, bfp_ref,
    o_ref,
    q_scr, m_scr, l_scr, acc_scr,
    *, n_head,
):
    ki = pl.program_id(2)
    nk = pl.num_programs(2)

    xq = xq_ref[0]                        # (TQ, C) f32
    TQ, C = xq.shape
    H = n_head
    D = C // H
    scale = 1.0 / math.sqrt(D)

    # ---- first KV step for this (batch, q-tile): head-batched, pre-scaled Q + reset
    @pl.when(ki == 0)
    def _init():
        hq = _layernorm(xq, ln1_g_ref[...], ln1_b_ref[...])
        hq_b = jnp.broadcast_to(hq.astype(jnp.bfloat16), (H, TQ, C))
        q = jnp.einsum("htc,hcd->htd", hq_b, wq_ref[...],
                       preferred_element_type=jnp.float32) + bq_ref[...]
        q_scr[...] = (q * scale).astype(jnp.bfloat16)      # fold 1/sqrt(D) into Q
        m_scr[...] = jnp.full(m_scr.shape, -jnp.inf, jnp.float32)
        l_scr[...] = jnp.zeros(l_scr.shape, jnp.float32)
        acc_scr[...] = jnp.zeros(acc_scr.shape, jnp.float32)

    # ---- per KV chunk: K/V projections + online-softmax update (all heads batched)
    xkv = xkv_ref[0]                      # (TK, C) f32
    TK = xkv.shape[0]
    hk = _layernorm(xkv, ln1_g_ref[...], ln1_b_ref[...]).astype(jnp.bfloat16)
    hk_b = jnp.broadcast_to(hk, (H, TK, C))
    k3 = (jnp.einsum("htc,hcd->htd", hk_b, wk_ref[...],
                     preferred_element_type=jnp.float32) + bk_ref[...]).astype(jnp.bfloat16)
    v3 = (jnp.einsum("htc,hcd->htd", hk_b, wv_ref[...],
                     preferred_element_type=jnp.float32) + bv_ref[...]).astype(jnp.bfloat16)

    s = jnp.einsum("hqd,hkd->hqk", q_scr[...], k3,
                   preferred_element_type=jnp.float32)     # (H, TQ, TK)
    m_prev = m_scr[...]                                    # (H, TQ, 1)
    m_new = jnp.maximum(m_prev, jnp.max(s, axis=-1, keepdims=True))
    alpha = jnp.exp(m_prev - m_new)
    p = jnp.exp(s - m_new)                                 # (H, TQ, TK)
    l_scr[...] = alpha * l_scr[...] + jnp.sum(p, axis=-1, keepdims=True)
    acc_scr[...] = alpha * acc_scr[...] + jnp.einsum(
        "hqk,hkd->hqd", p.astype(jnp.bfloat16), v3,
        preferred_element_type=jnp.float32)                # (H, TQ, D)
    m_scr[...] = m_new
    # TODO(synk): attn_dropout omitted (identity in eval mode).

    # ---- last KV step: output projection, residual, MLP, residual, write tile
    @pl.when(ki == nk - 1)
    def _finalize():
        inv_l = pl.reciprocal(l_scr[...], approx=True)     # EUP divide
        y3 = (acc_scr[...] * inv_l).astype(jnp.bfloat16)   # (H, TQ, D)
        # concat-over-heads followed by c_proj == sum over heads of per-head (D,C) projections
        y = jnp.sum(jnp.einsum("hqd,hdc->hqc", y3, wproj_ref[...],
                               preferred_element_type=jnp.float32), axis=0)
        y = y + bproj_ref[...]
        # TODO(synk): resid_dropout omitted (identity in eval mode).
        x1 = xq + y

        h2 = _layernorm(x1, ln2_g_ref[...], ln2_b_ref[...])
        ff = jnp.dot(h2.astype(jnp.bfloat16), wfc_ref[...],
                     preferred_element_type=jnp.float32) + bfc_ref[...]
        ff = _gelu_tanh(ff)
        ff = jnp.dot(ff.astype(jnp.bfloat16), wfp_ref[...],
                     preferred_element_type=jnp.float32) + bfp_ref[...]
        o_ref[0] = x1 + ff


def transformer_block(x, block_params, n_head):
    B, T, C = x.shape
    H = n_head
    D = C // H

    TQ = T if T <= 128 else 128
    TK = T if T <= 128 else 128
    assert T % TQ == 0 and T % TK == 0
    nq, nk = T // TQ, T // TK

    (ln1_g, ln1_b, w_attn, b_attn, w_proj, b_proj,
     ln2_g, ln2_b, w_fc, b_fc, w_fp, b_fp) = block_params

    # Per-head weight slabs prepared outside the kernel (plain XLA ops, once per call):
    # avoids every in-kernel lane slice / relayout / concatenate.
    def split_w(w):   # (C, C) -> (H, C, D), bf16
        return w.reshape(C, H, D).transpose(1, 0, 2).astype(jnp.bfloat16)

    def split_b(b):   # (1, C) -> (H, 1, D), f32
        return b.reshape(1, H, D).transpose(1, 0, 2)

    wq = split_w(w_attn[:, :C]); wk = split_w(w_attn[:, C:2 * C]); wv = split_w(w_attn[:, 2 * C:])
    bq = split_b(b_attn[:, :C]); bk = split_b(b_attn[:, C:2 * C]); bv = split_b(b_attn[:, 2 * C:])
    wproj_h = w_proj.reshape(H, D, C).astype(jnp.bfloat16)
    wfc16 = w_fc.astype(jnp.bfloat16)
    wfp16 = w_fp.astype(jnp.bfloat16)

    def spec2(shape):
        return pl.BlockSpec(shape, lambda bi, qi, ki: (0, 0))

    def spec3(shape):
        return pl.BlockSpec(shape, lambda bi, qi, ki: (0, 0, 0))

    in_specs = [
        pl.BlockSpec((1, TQ, C), lambda bi, qi, ki: (bi, qi, 0)),   # x (query rows)
        pl.BlockSpec((1, TK, C), lambda bi, qi, ki: (bi, ki, 0)),   # x (kv rows)
        spec2((1, C)), spec2((1, C)),                               # ln_1 gamma/beta
        spec3((H, C, D)), spec3((H, C, D)), spec3((H, C, D)),       # Wq, Wk, Wv
        spec3((H, 1, D)), spec3((H, 1, D)), spec3((H, 1, D)),       # bq, bk, bv
        spec3((H, D, C)), spec2((1, C)),                            # attn c_proj W/b
        spec2((1, C)), spec2((1, C)),                               # ln_2 gamma/beta
        spec2((C, 4 * C)), spec2((1, 4 * C)),                       # mlp c_fc W/b
        spec2((4 * C, C)), spec2((1, C)),                           # mlp c_proj W/b
    ]

    # Explicit VMEM budget (v7x: 64 MiB physical / 32 MiB default scoped).
    bf16, f32 = 2, 4
    weight_bytes = 12 * C * C * bf16                       # all bf16 matmul weights
    bias_bytes = (3 * H * D + 11 * C) * f32
    io_bytes = (2 * TQ * C + TK * C) * f32                 # xq, out, xkv tiles
    scratch_bytes = H * TQ * D * (bf16 + f32) + 2 * H * TQ * f32
    tmp_bytes = 4 * H * TQ * max(TK, C) * f32              # scores / probs / per-head proj temps
    vmem_limit = int(2 * (weight_bytes + bias_bytes + io_bytes)   # double-buffered operands
                     + scratch_bytes + tmp_bytes + (8 << 20))
    vmem_limit = max(32 << 20, min(64 << 20, vmem_limit))

    kernel = functools.partial(block_kernel, n_head=n_head)
    return pl.pallas_call(
        kernel,
        out_shape=jax.ShapeDtypeStruct((B, T, C), jnp.float32),
        grid=(B, nq, nk),
        in_specs=in_specs,
        out_specs=pl.BlockSpec((1, TQ, C), lambda bi, qi, ki: (bi, qi, 0)),
        scratch_shapes=[
            pltpu.VMEM((H, TQ, D), jnp.bfloat16),   # scaled Q (head-batched)
            pltpu.VMEM((H, TQ, 1), jnp.float32),    # running max m
            pltpu.VMEM((H, TQ, 1), jnp.float32),    # running sum l
            pltpu.VMEM((H, TQ, D), jnp.float32),    # output accumulator
        ],
        compiler_params=pltpu.CompilerParams(
            dimension_semantics=("parallel", "parallel", "arbitrary"),
            vmem_limit_bytes=vmem_limit),
    )(x, x, ln1_g, ln1_b, wq, wk, wv, bq, bk, bv,
      wproj_h, b_proj, ln2_g, ln2_b, wfc16, b_fc, wfp16, b_fp)


# ----------------------------------------------------------------------------------
# Final LayerNorm + lm_head kernel
# ----------------------------------------------------------------------------------
def head_kernel(x_ref, g_ref, b_ref, w_ref, bias_ref, o_ref):
    h = _layernorm(x_ref[0], g_ref[...], b_ref[...])
    o_ref[0] = jnp.dot(h.astype(jnp.bfloat16), w_ref[...],
                       preferred_element_type=jnp.float32) + bias_ref[...]


def lm_head(x, g, b, w, bias):
    B, T, C = x.shape
    n_class = w.shape[1]
    return pl.pallas_call(
        head_kernel,
        out_shape=jax.ShapeDtypeStruct((B, T, n_class), jnp.float32),
        grid=(B,),
        in_specs=[
            pl.BlockSpec((1, T, C), lambda bi: (bi, 0, 0)),
            pl.BlockSpec((1, C), lambda bi: (0, 0)),
            pl.BlockSpec((1, C), lambda bi: (0, 0)),
            pl.BlockSpec((C, n_class), lambda bi: (0, 0)),
            pl.BlockSpec((1, n_class), lambda bi: (0, 0)),
        ],
        out_specs=pl.BlockSpec((1, T, n_class), lambda bi: (bi, 0, 0)),
        compiler_params=pltpu.CompilerParams(dimension_semantics=("parallel",)),
    )(x, g, b, w.astype(jnp.bfloat16), bias)


# ----------------------------------------------------------------------------------
# Full Encoder forward
# ----------------------------------------------------------------------------------
def encoder_forward(x, params, n_head, block_size):
    B, T, F = x.shape
    assert T <= block_size
    pos_emb = params["wpe"][:T]                     # arange(T) lookup == slice
    h = embed(x, params["wte"], pos_emb)            # dropout = identity (eval)
    for bp in params["blocks"]:
        h = transformer_block(h, bp, n_head)
    return lm_head(h, params["lnf_g"], params["lnf_b"], params["head_w"], params["head_b"])


# ----------------------------------------------------------------------------------
# parameters + pure-JAX f32 reference
# ----------------------------------------------------------------------------------
def init_encoder_params(key, *, feature_dim, n_embd, block_size, n_layer, n_class):
    C = n_embd
    std = 0.02
    keys = jax.random.split(key, 3 + 4 * n_layer)
    it = iter(range(3 + 4 * n_layer))

    def nrm(shape):
        return jax.random.normal(keys[next(it)], shape, jnp.float32) * std

    blocks = []
    for _ in range(n_layer):
        blocks.append((
            jnp.ones((1, C), jnp.float32), jnp.zeros((1, C), jnp.float32),   # ln_1
            nrm((C, 3 * C)), jnp.zeros((1, 3 * C), jnp.float32),             # c_attn (in,out)
            nrm((C, C)), jnp.zeros((1, C), jnp.float32),                     # attn c_proj
            jnp.ones((1, C), jnp.float32), jnp.zeros((1, C), jnp.float32),   # ln_2
            nrm((C, 4 * C)), jnp.zeros((1, 4 * C), jnp.float32),             # mlp c_fc
            nrm((4 * C, C)), jnp.zeros((1, C), jnp.float32),                 # mlp c_proj
        ))
    return dict(
        wte=nrm((feature_dim, C)),
        wpe=nrm((block_size, C)),
        blocks=blocks,
        lnf_g=jnp.ones((1, C), jnp.float32),
        lnf_b=jnp.zeros((1, C), jnp.float32),
        head_w=nrm((C, n_class)),
        head_b=jnp.zeros((1, n_class), jnp.float32),
    )


def _ref_ln(h, g, b, eps=1e-5):
    mu = jnp.mean(h, -1, keepdims=True)
    var = jnp.mean((h - mu) ** 2, -1, keepdims=True)
    return (h - mu) / jnp.sqrt(var + eps) * g + b


def _ref_block(x, bp, n_head):
    (g1, b1, wa, ba, wp, bpj, g2, b2, wf, bf, wp2, bp2) = bp
    B, T, C = x.shape
    D = C // n_head
    h = _ref_ln(x, g1, b1)
    qkv = h @ wa + ba
    q, k, v = jnp.split(qkv, 3, axis=-1)
    q = q.reshape(B, T, n_head, D).transpose(0, 2, 1, 3)
    k = k.reshape(B, T, n_head, D).transpose(0, 2, 1, 3)
    v = v.reshape(B, T, n_head, D).transpose(0, 2, 1, 3)
    att = jnp.einsum("bhtd,bhsd->bhts", q, k) / math.sqrt(D)
    att = jax.nn.softmax(att, axis=-1)
    y = jnp.einsum("bhts,bhsd->bhtd", att, v)
    y = y.transpose(0, 2, 1, 3).reshape(B, T, C)
    y = y @ wp + bpj
    x1 = x + y
    h2 = _ref_ln(x1, g2, b2)
    ff = _gelu_tanh(h2 @ wf + bf) @ wp2 + bp2
    return x1 + ff


def reference_encoder(x, params, n_head):
    T = x.shape[1]
    h = x @ params["wte"] + params["wpe"][:T]
    for bp in params["blocks"]:
        h = _ref_block(h, bp, n_head)
    h = _ref_ln(h, params["lnf_g"], params["lnf_b"])
    return h @ params["head_w"] + params["head_b"]


if __name__ == "__main__":
    B, T, F, C = 2, 8, 16, 32
    n_head, n_layer, n_class, block_size = 4, 2, 10, 16

    key = jax.random.PRNGKey(0)
    kx, kp = jax.random.split(key)
    x = jax.random.normal(kx, (B, T, F), jnp.float32)
    params = init_encoder_params(kp, feature_dim=F, n_embd=C, block_size=block_size,
                                 n_layer=n_layer, n_class=n_class)

    logits = encoder_forward(x, params, n_head, block_size)
    logits = jax.block_until_ready(logits)

    ref = reference_encoder(x, params, n_head)
    assert logits.shape == (B, T, n_class)
    max_err = float(jnp.max(jnp.abs(logits - ref)))
    # bf16 matmuls with f32 accumulation -> compare against the f32 reference loosely.
    assert jnp.allclose(logits, ref, atol=2e-2, rtol=2e-2), f"mismatch vs reference (max abs err {max_err})"
    print("KERNEL_OK")
</pallas_src>

<mosaic_0001>
module attributes {stable_mosaic.version = 11 : i64} {
  func.func @embed_kernel(%arg0: i32, %arg1: memref<1x8x16xf32, #tpu.memory_space<vmem>>, %arg2: memref<16x32xbf16, #tpu.memory_space<vmem>>, %arg3: memref<8x32xf32, #tpu.memory_space<vmem>>, %arg4: memref<1x8x32xf32, #tpu.memory_space<vmem>>) attributes {dimension_semantics = [#tpu.dimension_semantics<parallel>], iteration_bounds = array<i64: 2>, scalar_prefetch = 0 : i64, scratch_operands = 0 : i64, tpu.core_type = #tpu.core_type<tc>, window_params = [{transform_indices = @transform_0, window_bounds = array<i64: 1, 8, 16>}, {pipeline_mode = #tpu.pipeline_mode<synchronous>, transform_indices = @transform_1, window_bounds = array<i64: 16, 32>}, {pipeline_mode = #tpu.pipeline_mode<synchronous>, transform_indices = @transform_2, window_bounds = array<i64: 8, 32>}, {transform_indices = @transform_3, window_bounds = array<i64: 1, 8, 32>}]} {
    %c0 = arith.constant 0 : index
    %c0_0 = arith.constant 0 : index
    %c0_1 = arith.constant 0 : index
    %0 = vector.load %arg1[%c0, %c0_0, %c0_1] : memref<1x8x16xf32, #tpu.memory_space<vmem>>, vector<1x8x16xf32>
    %1 = vector.shape_cast %0 : vector<1x8x16xf32> to vector<8x16xf32>
    %2 = arith.truncf %1 : vector<8x16xf32> to vector<8x16xbf16>
    %c0_2 = arith.constant 0 : index
    %c0_3 = arith.constant 0 : index
    %3 = vector.load %arg2[%c0_2, %c0_3] : memref<16x32xbf16, #tpu.memory_space<vmem>>, vector<16x32xbf16>
    %cst = arith.constant dense<0.000000e+00> : vector<8x32xf32>
    %4 = tpu.matmul %2, %3, %cst {dimension_numbers = #tpu.dot_dimension_numbers<[1], [0], [0], [1], [0, 0, 1, 1], [], []>} : vector<8x16xbf16>, vector<16x32xbf16>, vector<8x32xf32> -> vector<8x32xf32>
    %c0_4 = arith.constant 0 : index
    %c0_5 = arith.constant 0 : index
    %5 = vector.load %arg3[%c0_4, %c0_5] : memref<8x32xf32, #tpu.memory_space<vmem>>, vector<8x32xf32>
    %6 = arith.addf %4, %5 : vector<8x32xf32>
    %c0_6 = arith.constant 0 : index
    %c0_7 = arith.constant 0 : index
    %c0_8 = arith.constant 0 : index
    %7 = vector.load %arg4[%c0_6, %c0_7, %c0_8] : memref<1x8x32xf32, #tpu.memory_space<vmem>>, vector<1x8x32xf32>
    %8 = vector.shape_cast %7 : vector<1x8x32xf32> to vector<8x32xf32>
    %9 = vector.shape_cast %6 : vector<8x32xf32> to vector<1x8x32xf32>
    tpu.vector_store %arg4[%c0_6, %c0_7, %c0_8], %9 {strides = array<i32>} : memref<1x8x32xf32, #tpu.memory_space<vmem>>, vector<1x8x32xf32>,
    return
  }
  func.func @transform_0(%arg0: i32) -> (i32, i32, i32) {
    %c0_i32 = arith.constant 0 : i32
    %c0_i32_0 = arith.constant 0 : i32
    %c0_i32_1 = arith.constant 0 : i32
    return %arg0, %c0_i32, %c0_i32_0 : i32, i32, i32
  }
  func.func @transform_1(%arg0: i32) -> (i32, i32) {
    %c0_i32 = arith.constant 0 : i32
    %c0_i32_0 = arith.constant 0 : i32
    %c0_i32_1 = arith.constant 0 : i32
    return %c0_i32, %c0_i32_0 : i32, i32
  }
  func.func @transform_2(%arg0: i32) -> (i32, i32) {
    %c0_i32 = arith.constant 0 : i32
    %c0_i32_0 = arith.constant 0 : i32
    %c0_i32_1 = arith.constant 0 : i32
    return %c0_i32, %c0_i32_0 : i32, i32
  }
  func.func @transform_3(%arg0: i32) -> (i32, i32, i32) {
    %c0_i32 = arith.constant 0 : i32
    %c0_i32_0 = arith.constant 0 : i32
    %c0_i32_1 = arith.constant 0 : i32
    return %arg0, %c0_i32, %c0_i32_0 : i32, i32, i32
  }
}

</mosaic_0001>

<bundles_post_ra>
// kernel: tpu_custom_call.1
= control target key start
LH: loop header
LB: loop body
LE: loop exit
PB: predicated region body
PF: predicated region fallthrough
CT: control target
= control target key end

     0   :  { %8 = vsyncpa [#allocation3], 0  ;;  %s777_s0 = inlined_call_operand.hbm [shape: f32[2,8,16], index: 0, kind: input, shape index: {}]   ;;  %s778_s1 = inlined_call_operand.hbm [shape: bf16[16,32], index: 1, kind: input, shape index: {}]   ;;  %s779_s2 = inlined_call_operand.hbm [shape: f32[8,32], index: 2, kind: input, shape index: {}]   ;;  %s780_s3 = inlined_call_operand.hbm [shape: f32[2,8,32], index: 3, kind: output, shape index: {}]  }
   0x1   :  { %10 = vsyncpa [#allocation3 + $0x1], 0 }
   0x2   :  { %11 = vsyncpa [#allocation6], 0 }
   0x3   :  { %12 = vsyncpa [#allocation4], 0 }
   0x4   :  { %14 = vsyncpa [#allocation4 + $0x1], 0  ;;  %s632_s12 = smov 0   ;;  %s634_s13 = smov 0  }
   0x5   :  { %s636_s14 = smov 0   ;;  %s638_s15 = smov 0  }
   0x6 LB: > { %s130_s18 = sshll.u32 %s778_s1, 4  ;;  %s656_s19 = sadd.s32 4294967295, %s606_s15   ;;  %s606_s15 = sphi %s638_s15, %s791_s15   ;;  %s602_s14 = sphi %s636_s14, %s790_s14   ;;  %s598_s13 = sphi %s634_s13, %s789_s13   ;;  %s594_s12 = sphi %s632_s12, %s788_s12   ;;  %s131_s18 = int_to_ptr.hbm [resolvable:$true] %s130_s18 }
   0x7   : > { %p356_p0 = scmp.ge.s32.totalorder %s606_s15, 1  ;;  %p41_p1 = scmp.eq.s32.totalorder %s656_s19, 0 }
   0x8   : > { %p119_p2 = scmp.lt.s32.totalorder %s606_s15, 3  ;;  %s608_s21 = smov [#allocation5]  }
   0x9   : > { %s132_s22 = sshll.u32 %s608_s21, 4  ;;  %s145_s25 = sshll.u32 %s779_s2, 4  ;;  %s133_s22 = int_to_ptr.vmem [resolvable:$true] %s132_s22  ;;  %s146_s25 = int_to_ptr.hbm [resolvable:$true] %s145_s25 }
   0xa   : > { %p661_p3 = pnand %p356_p0, %p119_p2  ;;  %s609_s26 = smov [#allocation7]  }
   0xb   : > { %s147_s27 = sshll.u32 %s609_s26, 4  ;;  %s610_s28 = smov 64   ;;  %s148_s27 = int_to_ptr.vmem [resolvable:$true] %s147_s27 }
   0xc   : > { %p389_p4 = pneg %p661_p3  ;;  %s611_s29 = smov 4  }
   0xd   : > { %s355_s30 = sadd.s32 4294967294, %s606_s15   ;;  %s675_s4 = sadd.s32 1, %s606_s15  }
   0xe   : > { %p390_p6 = pnand %p389_p4, %p41_p1  ;;  %s24_s5 = ssub.s32 %s606_s15, %s675_s4 }
   0xf   : > { %s27_s6 = sadd.s32 1, %s602_s14  ;;  %p25_p7 = scmp.eq.s32.totalorder %s24_s5, 0 }
  0x10   : > { %392 = dma.hbm_to_vmem [thread:$0]  (!%p390_p6), %s131_s18, 128, %s133_s22, [#allocation6], %s610_s28, %s610_s28, %s611_s29  }
  0x11   : > { %395 = dma.hbm_to_vmem [thread:$0]  (!%p390_p6), %s146_s25, 128, %s148_s27, [#allocation6]  }
  0x12   : > { %p34_p8 = scmp.ne.s32.totalorder %s602_s14, %s598_s13  ;;  %p35_p9 = scmp.eq.s32.totalorder %s606_s15, 0 }
  0x13   : > { %p40_p10 = scmp.ne.s32.totalorder %s598_s13, %s594_s12  ;;  %p106_p13 = scmp.eq.s32.totalorder %s656_s19, 1 }
  0x14   : > { %s686_s7 = scalar_select %p25_p7, %s602_s14, %s27_s6  }
  0x15   : > { %p688_p11 = por %p35_p9, %p34_p8  ;;  %p694_p12 = por %p41_p1, %p40_p10 }
  0x16   : > { %p112_p0 = scmp.eq.s32.totalorder %s355_s30, 1  ;;  %p406_p2 = scmp.lt.s32.totalorder %s606_s15, 2 }
  0x17   : > { %s158_s10 = sand.u32 1, %s602_s14   ;;  %p701_p4 = por %p106_p13, %p34_p8 }
  0x18   : > { %p705_p6 = por %p112_p0, %p40_p10  ;;  %s360_s17 = sshll.u32 %s158_s10, 3 }
  0x19   : > { %s361_s18 = sshll.u32 %s606_s15, 3  ;;  %s162_s24 = scalar_lea.vmem [#allocation2], %s360_s17 }
  0x1a   : > { %s166_s23 = scalar_lea.hbm %s777_s0, %s361_s18  ;;  %s170_s25 = sshll.u32 %s162_s24, 4  ;;  %s171_s25 = int_to_ptr.vmem [resolvable:$true] %s170_s25 }
  0x1b   : > { %s168_s26 = sshll.u32 %s166_s23, 4  ;;  %p715_p7 = pnand %p406_p2, %p688_p11  ;;  %s169_s26 = int_to_ptr.hbm [resolvable:$true] %s168_s26 }
  0x1c   : > { %s159_s28 = scalar_lea.sflag [#allocation3], %s158_s10  ;;  %s506_s29 = sshra.s32 %s169_s26, 4  ;;  %s507_s29 = int_to_ptr.hbm [resolvable:$true] %s506_s29 }
  0x1d   : > { %s508_s30 = scalar_lea.hbm %s507_s29, 8  ;;  %p510_p9 = pneg %p715_p7 }
  0x1e   : > { %p509_p8 = scmp.ne.s32.totalorder %s507_s29, %s508_s30  ;;  %s513_s17 = scalar_lea.hbm %s777_s0, 16 }
  0x1f   : > { %p514_p11 = scmp.lt.s32.totalorder %s507_s29, %s777_s0  ;;  %p515_p0 = scmp.lt.s32.totalorder %s513_s17, %s508_s30 }
  0x20   : > { %p511_p10 = pnand %p510_p9, %p509_p8 }
  0x21   : > { %p516_p2 = por %p515_p0, %p514_p11 }
  0x22   : > { %p512_p13 = pneg %p511_p10 }
  0x24   : > { %p517_p5 = pnand %p516_p2, %p512_p13 }
  0x26   : > { %520 = shalt.err (!%p517_p5)
}
  0x27   : > { %399 = dma.hbm_to_vmem [thread:$0]  (!%p715_p7), %s169_s26, 128, %s171_s25, %s159_s28  }
  0x28   : > { %179 = sbr.rel (%p661_p3) target bundleno = 186 (0xba), region = 32  ;;  %s732_s10 = sand.u32 (!%p661_p3), 1, %s598_s13  }
  0x29   : > { %s363_s21 = sshll.u32 (!%p661_p3), %s732_s10, 3  ;;  %s182_s22 = scalar_lea.sflag (!%p661_p3), [#allocation3], %s732_s10 }
  0x2a   : > { %s185_s23 = scalar_lea.vmem (!%p661_p3), [#allocation2], %s363_s21 }
  0x2d   : > { %581 = dma.done.wait (%p694_p12), %s182_s22, 128  }
  0x2e   : > { %583 = vsyncadd (%p694_p12), %s182_s22, 4294967168 }
  0x2f   : > { %585 = dma.done.wait (%p41_p1), [#allocation6], 256  }
  0x30   : > { %587 = vsyncadd (%p41_p1), [#allocation6], 4294967040  ;;  %v376_v0 = vld [vmem:[#allocation5] sm:$0xff]  ;;  %v220_v1 = vld [vmem:[%s185_s23] sm:$0xff]  ;;  %vm231_vm0 = vcmask 130048   ;;  %s373_s20 = sshll.u32 %s656_s19, 3 }
  0x31   : > { %v221_v2 = vpack.c.bf16 %v220_v1, %v220_v1  ;;  %242 = vmatpush.bf16.msra.mxu0 %v376_v0  ;;  %s261_s9 = scalar_lea.hbm %s780_s3, %s373_s20  ;;  %v224_v3 = vld [vmem:[#allocation7] sm:$0xff]  ;;  %s218_s26 = scalar_lea.vmem [#allocation8], %s363_s21  ;;  %vm248_vm1 = vcmask 261120  }
  0x32   : > { %s263_s27 = sshll.u32 %s218_s26, 4  ;;  %s265_s28 = sshll.u32 %s261_s9, 4  ;;  %s264_s27 = int_to_ptr.vmem [resolvable:$true] %s263_s27  ;;  %s266_s28 = int_to_ptr.hbm [resolvable:$true] %s265_s28 }
  0x33   : > { %s251_s29 = scalar_lea.sflag [#allocation4], %s732_s10  ;;  %s550_s30 = sshra.s32 %s266_s28, 4  ;;  %s551_s30 = int_to_ptr.hbm [resolvable:$true] %s550_s30 }
  0x34   : > { %371 = vmatmul.msk.bf16.vlgmr.msra.gmra.mxu0 %vm231_vm0, %v221_v2  ;;  %s552_s5 = scalar_lea.hbm %s551_s30, 8  ;;  %s556_s17 = scalar_lea.hbm %s780_s3, 16 }
  0x35   : > { %p553_p1 = scmp.ne.s32.totalorder %s551_s30, %s552_s5  ;;  %p557_p12 = scmp.lt.s32.totalorder %s551_s30, %s780_s3 }
  0x36   : > { %p558_p7 = scmp.lt.s32.totalorder %s556_s17, %s552_s5 }
  0x37   : > { %p554_p3 = pnand %p553_p1, %p701_p4 }
  0x38   : > { %p559_p8 = por %p558_p7, %p557_p12 }
  0x39   : > { %p555_p5 = pneg %p554_p3 }
  0x3b   : > { %p560_p9 = pnand %p559_p8, %p555_p5 }
  0xb1   : > { %v244_v4 = vpop.f32.mrf.mxu0 }
  0xb2   : > { %v245_v5 = vadd.f32 %v244_v4, %v224_v3 }
  0xb4   : > { %249 = vst.msk [vmem:[%s218_s26] sm:$0xff] %vm248_vm1, %v245_v5 }
  0xb5   : > { %563 = shalt.err (!%p560_p9)
}
  0xb6   : > { %387 = dma.vmem_to_hbm [thread:$0]  (%p701_p4), %s264_s27, 128, %s266_s28, %s251_s29  }
  0xb9   : > { %v246_v6 = vpop.f32.mrf.mxu0 }
  0xba PF: > { %s277_s10 = sand.u32 1, %s594_s12   ;;  %p787_p10 = scmp.ge.s32.totalorder %s606_s15, 2 }
  0xbb   : > { %s278_s21 = scalar_lea.sflag [#allocation4], %s277_s10 }
  0xbc   : > { %p401_p13 = pnand %p787_p10, %p705_p6 }
  0xbe   : > { %p402_p11 = pneg %p401_p13 }
  0xc0   : > { %589 = dma.done.wait (%p402_p11), %s278_s21, 128  }
  0xc1   : > { %591 = vsyncadd (%p402_p11), %s278_s21, 4294967168  ;;  %p17_p0 = scmp.ge.s32.totalorder %s675_s4, 4   ;;  %s788_s12 = smov %s598_s13 }
  0xc2   : > { %s789_s13 = smov %s602_s14  ;;  %s790_s14 = smov %s686_s7 }
  0xc3   : > { %s791_s15 = smov %s675_s4  ;;  %19 = sbr.rel (!%p17_p0) target bundleno = 6 (0x6), region = 85 }
  0xc8   :  { %284 = vsyncpa [#allocation3], 1 }
  0xc9   :  { %286 = vsyncpa [#allocation3 + $0x1], 1 }
  0xca   :  { %287 = vsyncpa [#allocation6], 1 }
  0xcb   :  { %288 = vsyncpa [#allocation4], 1 }
  0xcc   :  { %290 = vsyncpa [#allocation4 + $0x1], 1 }

</bundles_post_ra>
